<compile_context>
chip_gen: v6e
topology: v6e:2x2x1
jax: 0.10.0
libtpu: 0.0.40
codegen_flags: <defaults>
</compile_context>

<pallas_src>
import functools

import jax
import jax.numpy as jnp
import numpy as np
from jax.experimental import pallas as pl
from jax.experimental.pallas import tpu as pltpu


def _ldam_tile(x_ref, tgt_ref, m_ref, w_ref, out_ref, *, s, n_valid, tb):
    # x_ref:   [TB, C] logits (native dtype, VMEM)
    # tgt_ref: [TB, 1] i32 class indices (VMEM)
    # m_ref:   [1, C]  per-class margins (VMEM)
    # w_ref:   [1, C]  per-class CE weights, or None (weight=None fast path)
    # out_ref: [1, 8, 128] f32; sublanes 0-3 = sum(w_i*nll), 4-7 = sum(w_i)
    x = x_ref[...].astype(jnp.float32)             # [TB, C]
    tgt = tgt_ref[...]                             # [TB, 1]
    m_list = m_ref[...].astype(jnp.float32)        # [1, C]
    TB, C = x.shape

    # one-hot of "index.scatter_(1, target, 1)"
    col = jax.lax.broadcasted_iota(jnp.int32, (TB, C), 1)
    onehot = (col == tgt).astype(jnp.float32)      # [TB, C]

    # true-class logit and margin (two lane reductions; true_logit is derived
    # algebraically instead of a third onehot*logits reduce)
    x_true = jnp.sum(onehot * x, axis=1, keepdims=True)        # [TB, 1]
    batch_m = jnp.sum(onehot * m_list, axis=1, keepdims=True)  # [TB, 1]

    # output = where(index, x - batch_m, x), scaled by s
    logits = s * (x - onehot * batch_m)            # [TB, C]

    # numerically stable log-sum-exp
    row_max = jnp.max(logits, axis=1, keepdims=True)
    sum_exp = jnp.sum(jnp.exp(logits - row_max), axis=1, keepdims=True)
    lse = row_max + jnp.log(sum_exp)               # [TB, 1]
    nll = lse - s * (x_true - batch_m)             # [TB, 1]

    # mask rows past the real batch size (ragged last tile)
    row = jax.lax.broadcasted_iota(jnp.int32, (TB, 1), 0) + pl.program_id(0) * tb
    valid = (row < n_valid).astype(jnp.float32)    # [TB, 1]

    if w_ref is None:
        w_i = valid                                # plain mean: weight ≡ 1
    else:
        w = w_ref[...].astype(jnp.float32)
        w_i = jnp.sum(onehot * w, axis=1, keepdims=True) * valid

    num = jnp.sum(w_i * nll)                       # partial numerator
    den = jnp.sum(w_i)                             # partial denominator

    sub = jax.lax.broadcasted_iota(jnp.int32, (8, 128), 0)
    out_ref[0] = jnp.where(sub < 4, num, den)      # lane-dense partial-sum tile


def _ldam_kernel_weighted(x_ref, tgt_ref, m_ref, w_ref, out_ref, *, s, n_valid, tb):
    _ldam_tile(x_ref, tgt_ref, m_ref, w_ref, out_ref, s=s, n_valid=n_valid, tb=tb)


def _ldam_kernel_unweighted(x_ref, tgt_ref, m_ref, out_ref, *, s, n_valid, tb):
    _ldam_tile(x_ref, tgt_ref, m_ref, None, out_ref, s=s, n_valid=n_valid, tb=tb)


def _round_up(n, k):
    return ((n + k - 1) // k) * k


def _pick_tb(B, C, itemsize):
    # Keep double-buffered native-dtype x tile + f32 working temps well inside
    # the scoped-VMEM budget of every generation (16 MiB v5e, 32 MiB v6e/v7x;
    # v7x physical VMEM is only 64 MiB, so stay conservative).
    budget = 12 << 20
    per_row = max(1, C * (2 * itemsize + 6 * 4))
    tb = 1024
    while tb > 8 and tb * per_row > budget:
        tb //= 2
    return max(8, min(tb, _round_up(B, 8)))


def ldam_loss(x, target, m_list, *, s=30.0, weight=None, tb=None):
    """Pallas-backed LDAMLoss.forward.  x: [B, C], target: [B] int."""
    B, C = x.shape
    itemsize = jnp.dtype(x.dtype).itemsize
    tgt = target.astype(jnp.int32).reshape(B, 1)
    m = jnp.asarray(m_list).reshape(1, C)

    if tb is None:
        tb = _pick_tb(B, C, itemsize)
    tb = max(8, int(tb))
    if tb % 8:
        tb += 8 - tb % 8

    b_pad = _round_up(B, tb)
    num_tiles = b_pad // tb
    if b_pad != B:
        x = jnp.pad(x, ((0, b_pad - B), (0, 0)))
        tgt = jnp.pad(tgt, ((0, b_pad - B), (0, 0)))

    in_specs = [
        pl.BlockSpec((tb, C), lambda i: (i, 0)),   # x (streamed, double-buffered)
        pl.BlockSpec((tb, 1), lambda i: (i, 0)),   # target
        pl.BlockSpec((1, C), lambda i: (0, 0)),    # m_list (resident)
    ]
    args = [x, tgt, m]
    if weight is not None:
        w = jnp.asarray(weight).reshape(1, C)
        in_specs.append(pl.BlockSpec((1, C), lambda i: (0, 0)))
        args.append(w)
        kernel = functools.partial(_ldam_kernel_weighted, s=float(s), n_valid=B, tb=tb)
    else:
        # weight=None: skip the w HBM stream and one lane reduction entirely
        kernel = functools.partial(_ldam_kernel_unweighted, s=float(s), n_valid=B, tb=tb)

    # double-buffered x tile (native dtype) + f32 temps + slack, clamped to a
    # range that is safe on every generation (incl. v7x's 64 MiB physical VMEM)
    est = 2 * tb * C * itemsize + 6 * tb * C * 4 + (2 << 20)
    vmem_limit = int(min(max(est, 32 << 20), 48 << 20))

    partials = pl.pallas_call(
        kernel,
        out_shape=jax.ShapeDtypeStruct((num_tiles, 8, 128), jnp.float32),
        grid=(num_tiles,),
        in_specs=in_specs,
        out_specs=pl.BlockSpec((1, 8, 128), lambda i: (i, 0, 0)),
        compiler_params=pltpu.CompilerParams(
            dimension_semantics=("parallel",),
            vmem_limit_bytes=vmem_limit),
    )(*args)

    num = jnp.sum(partials[:, 0, 0])   # sum(w_i * nll_i)
    den = jnp.sum(partials[:, 4, 0])   # sum(w_i)  (== B when weight=None)
    return num / den


def make_m_list(cls_num_list, max_m=0.5):
    """Deterministic parameter init matching LDAMLoss.__init__."""
    m = 1.0 / np.sqrt(np.sqrt(np.asarray(cls_num_list, dtype=np.float64)))
    m = m * (max_m / np.max(m))
    return jnp.asarray(m, dtype=jnp.float32)


def _reference_ldam(x, target, m_list, s=30.0, weight=None):
    # pure-JAX reference of the PyTorch forward ('mean' reduction semantics)
    C = x.shape[1]
    xf = x.astype(jnp.float32)
    onehot = jax.nn.one_hot(target, C, dtype=jnp.float32)
    batch_m = (onehot * m_list[None, :]).sum(axis=1, keepdims=True)
    logits = s * jnp.where(onehot > 0, xf - batch_m, xf)
    logp = jax.nn.log_softmax(logits, axis=1)
    nll = -(onehot * logp).sum(axis=1)
    if weight is None:
        return nll.mean()
    w_i = (onehot * weight[None, :]).sum(axis=1)
    return (w_i * nll).sum() / w_i.sum()


if __name__ == "__main__":
    # module params (synthetic, deterministic)
    cls_num_list = [500, 200, 100, 60, 40, 25, 15, 10, 6, 4]   # 10 classes
    max_m, s = 0.5, 30.0
    m_list = make_m_list(cls_num_list, max_m)

    # inputs: logits [B, C], integer targets [B]
    B, C = 40, len(cls_num_list)
    key = jax.random.PRNGKey(0)
    kx, kt = jax.random.split(key)
    x = jax.random.normal(kx, (B, C), dtype=jnp.float32)
    target = jax.random.randint(kt, (B,), 0, C, dtype=jnp.int32)

    # weight=None path; tb=16 exercises the batch grid and ragged-tail masking
    loss = jax.block_until_ready(ldam_loss(x, target, m_list, s=s, weight=None, tb=16))
    ref = _reference_ldam(x, target, m_list, s=s)
    assert np.allclose(np.asarray(loss), np.asarray(ref), rtol=1e-5, atol=1e-5), (
        float(loss), float(ref))

    # weighted cross-entropy path (weighted-mean reduction)
    weight = jnp.linspace(0.5, 1.5, C, dtype=jnp.float32)
    loss_w = jax.block_until_ready(
        ldam_loss(x, target, m_list, s=s, weight=weight, tb=16))
    ref_w = _reference_ldam(x, target, m_list, s=s, weight=weight)
    assert np.allclose(np.asarray(loss_w), np.asarray(ref_w), rtol=1e-5, atol=1e-5), (
        float(loss_w), float(ref_w))

    # bf16 logits streamed in native dtype (halves HBM bytes; math stays f32)
    loss_bf16 = jax.block_until_ready(
        ldam_loss(x.astype(jnp.bfloat16), target, m_list, s=s, weight=None, tb=16))
    assert np.isfinite(float(loss_bf16))

    print("KERNEL_OK")
</pallas_src>

<mosaic_0001>
module attributes {stable_mosaic.version = 11 : i64} {
  func.func @_ldam_kernel_unweighted(%arg0: i32, %arg1: memref<16x10xf32, #tpu.memory_space<vmem>>, %arg2: memref<16x1xi32, #tpu.memory_space<vmem>>, %arg3: memref<1x10xf32, #tpu.memory_space<vmem>>, %arg4: memref<1x8x128xf32, #tpu.memory_space<vmem>>) attributes {dimension_semantics = [#tpu.dimension_semantics<parallel>], iteration_bounds = array<i64: 3>, scalar_prefetch = 0 : i64, scratch_operands = 0 : i64, tpu.core_type = #tpu.core_type<tc>, window_params = [{transform_indices = @transform_0, window_bounds = array<i64: 16, 10>}, {transform_indices = @transform_1, window_bounds = array<i64: 16, 1>}, {pipeline_mode = #tpu.pipeline_mode<synchronous>, transform_indices = @transform_2, window_bounds = array<i64: 1, 10>}, {transform_indices = @transform_3, window_bounds = array<i64: 1, 8, 128>}]} {
    %c0 = arith.constant 0 : index
    %c0_0 = arith.constant 0 : index
    %0 = vector.load %arg1[%c0, %c0_0] : memref<16x10xf32, #tpu.memory_space<vmem>>, vector<16x10xf32>
    %c0_1 = arith.constant 0 : index
    %c0_2 = arith.constant 0 : index
    %1 = vector.load %arg2[%c0_1, %c0_2] : memref<16x1xi32, #tpu.memory_space<vmem>>, vector<16x1xi32>
    %c0_3 = arith.constant 0 : index
    %c0_4 = arith.constant 0 : index
    %2 = vector.load %arg3[%c0_3, %c0_4] : memref<1x10xf32, #tpu.memory_space<vmem>>, vector<1x10xf32>
    %3 = tpu.iota {dimensions = array<i32: 1>} : vector<16x10xi32>
    %4 = vector.broadcast %1 : vector<16x1xi32> to vector<16x10xi32>
    %5 = arith.cmpi eq, %3, %4 : vector<16x10xi32>
    %6 = arith.extui %5 : vector<16x10xi1> to vector<16x10xi32>
    %7 = arith.sitofp %6 : vector<16x10xi32> to vector<16x10xf32>
    %8 = arith.mulf %7, %0 : vector<16x10xf32>
    %cst = arith.constant dense<0.000000e+00> : vector<16xf32>
    %9 = vector.multi_reduction <add>, %8, %cst [1] : vector<16x10xf32> to vector<16xf32>
    %10 = vector.shape_cast %9 : vector<16xf32> to vector<16x1xf32>
    %11 = vector.broadcast %2 : vector<1x10xf32> to vector<16x10xf32>
    %12 = arith.mulf %7, %11 : vector<16x10xf32>
    %cst_5 = arith.constant dense<0.000000e+00> : vector<16xf32>
    %13 = vector.multi_reduction <add>, %12, %cst_5 [1] : vector<16x10xf32> to vector<16xf32>
    %14 = vector.shape_cast %13 : vector<16xf32> to vector<16x1xf32>
    %15 = vector.broadcast %14 : vector<16x1xf32> to vector<16x10xf32>
    %16 = arith.mulf %7, %15 : vector<16x10xf32>
    %17 = arith.subf %0, %16 : vector<16x10xf32>
    %cst_6 = arith.constant 3.000000e+01 : f32
    %18 = vector.broadcast %cst_6 : f32 to vector<16x10xf32>
    %19 = arith.mulf %18, %17 : vector<16x10xf32>
    %cst_7 = arith.constant dense<0xFF800000> : vector<16xf32>
    %20 = vector.multi_reduction <maximumf>, %19, %cst_7 [1] : vector<16x10xf32> to vector<16xf32>
    %21 = vector.shape_cast %20 : vector<16xf32> to vector<16x1xf32>
    %22 = vector.broadcast %21 : vector<16x1xf32> to vector<16x10xf32>
    %23 = arith.subf %19, %22 : vector<16x10xf32>
    %24 = math.exp %23 : vector<16x10xf32>
    %cst_8 = arith.constant dense<0.000000e+00> : vector<16xf32>
    %25 = vector.multi_reduction <add>, %24, %cst_8 [1] : vector<16x10xf32> to vector<16xf32>
    %26 = vector.shape_cast %25 : vector<16xf32> to vector<16x1xf32>
    %27 = math.log %26 : vector<16x1xf32>
    %28 = arith.addf %21, %27 : vector<16x1xf32>
    %29 = arith.subf %10, %14 : vector<16x1xf32>
    %cst_9 = arith.constant 3.000000e+01 : f32
    %30 = vector.broadcast %cst_9 : f32 to vector<16x1xf32>
    %31 = arith.mulf %30, %29 : vector<16x1xf32>
    %32 = arith.subf %28, %31 : vector<16x1xf32>
    %33 = tpu.iota {dimensions = array<i32: 0>} : vector<16x1xi32>
    %c16_i32 = arith.constant 16 : i32
    %34 = arith.muli %arg0, %c16_i32 : i32
    %35 = vector.broadcast %34 : i32 to vector<16x1xi32>
    %36 = arith.addi %33, %35 : vector<16x1xi32>
    %c40_i32 = arith.constant 40 : i32
    %37 = vector.broadcast %c40_i32 : i32 to vector<16x1xi32>
    %38 = arith.cmpi slt, %36, %37 : vector<16x1xi32>
    %39 = arith.extui %38 : vector<16x1xi1> to vector<16x1xi32>
    %40 = arith.sitofp %39 : vector<16x1xi32> to vector<16x1xf32>
    %41 = arith.mulf %40, %32 : vector<16x1xf32>
    %42 = vector.shape_cast %41 : vector<16x1xf32> to vector<1x16x1xf32>
    %cst_10 = arith.constant dense<0.000000e+00> : vector<1xf32>
    %43 = vector.multi_reduction <add>, %42, %cst_10 [1, 2] : vector<1x16x1xf32> to vector<1xf32>
    %44 = vector.shape_cast %43 : vector<1xf32> to vector<1x1x1xf32>
    %45 = vector.extract %44[0, 0, 0] : f32 from vector<1x1x1xf32>
    %46 = vector.shape_cast %40 : vector<16x1xf32> to vector<1x16x1xf32>
    %cst_11 = arith.constant dense<0.000000e+00> : vector<1xf32>
    %47 = vector.multi_reduction <add>, %46, %cst_11 [1, 2] : vector<1x16x1xf32> to vector<1xf32>
    %48 = vector.shape_cast %47 : vector<1xf32> to vector<1x1x1xf32>
    %49 = vector.extract %48[0, 0, 0] : f32 from vector<1x1x1xf32>
    %50 = tpu.iota {dimensions = array<i32: 0>} : vector<8x128xi32>
    %c4_i32 = arith.constant 4 : i32
    %51 = vector.broadcast %c4_i32 : i32 to vector<8x128xi32>
    %52 = arith.cmpi slt, %50, %51 : vector<8x128xi32>
    %53 = vector.broadcast %45 : f32 to vector<8x128xf32>
    %54 = vector.broadcast %49 : f32 to vector<8x128xf32>
    %55 = arith.select %52, %53, %54 : vector<8x128xi1>, vector<8x128xf32>
    %c0_12 = arith.constant 0 : index
    %c0_13 = arith.constant 0 : index
    %c0_14 = arith.constant 0 : index
    %56 = vector.load %arg4[%c0_12, %c0_13, %c0_14] : memref<1x8x128xf32, #tpu.memory_space<vmem>>, vector<1x8x128xf32>
    %57 = vector.shape_cast %56 : vector<1x8x128xf32> to vector<8x128xf32>
    %58 = vector.shape_cast %55 : vector<8x128xf32> to vector<1x8x128xf32>
    tpu.vector_store %arg4[%c0_12, %c0_13, %c0_14], %58 {strides = array<i32>} : memref<1x8x128xf32, #tpu.memory_space<vmem>>, vector<1x8x128xf32>,
    return
  }
  func.func @transform_0(%arg0: i32) -> (i32, i32) {
    %c0_i32 = arith.constant 0 : i32
    %c0_i32_0 = arith.constant 0 : i32
    return %arg0, %c0_i32 : i32, i32
  }
  func.func @transform_1(%arg0: i32) -> (i32, i32) {
    %c0_i32 = arith.constant 0 : i32
    %c0_i32_0 = arith.constant 0 : i32
    return %arg0, %c0_i32 : i32, i32
  }
  func.func @transform_2(%arg0: i32) -> (i32, i32) {
    %c0_i32 = arith.constant 0 : i32
    %c0_i32_0 = arith.constant 0 : i32
    %c0_i32_1 = arith.constant 0 : i32
    return %c0_i32, %c0_i32_0 : i32, i32
  }
  func.func @transform_3(%arg0: i32) -> (i32, i32, i32) {
    %c0_i32 = arith.constant 0 : i32
    %c0_i32_0 = arith.constant 0 : i32
    %c0_i32_1 = arith.constant 0 : i32
    return %arg0, %c0_i32, %c0_i32_0 : i32, i32, i32
  }
}

</mosaic_0001>

<bundles_post_ra>
// kernel: tpu_custom_call.1
= control target key start
LH: loop header
LB: loop body
LE: loop exit
PB: predicated region body
PF: predicated region fallthrough
CT: control target
= control target key end

     0   :  { %8 = vsyncpa [#allocation3], 0  ;;  %s675_s0 = inlined_call_operand.vmem [shape: f32[48,10], index: 0, kind: input, shape index: {}]   ;;  %s676_s1 = inlined_call_operand.vmem [shape: s32[48,1], index: 1, kind: input, shape index: {}]   ;;  %s677_s2 = inlined_call_operand.vmem [shape: f32[1,10], index: 2, kind: input, shape index: {}]   ;;  %s678_s3 = inlined_call_operand.hbm [shape: f32[3,8,128], index: 3, kind: output, shape index: {}]  }
   0x1   :  { %10 = vsyncpa [#allocation3 + $0x1], 0  ;;  %s559_s12 = smov 0   ;;  %s561_s13 = smov 0  }
   0x2   :  { %s563_s14 = smov 0   ;;  %s565_s15 = smov 0  }
   0x3 LB: > { %s580_s16 = sadd.s32 4294967295, %s534_s15   ;;  %s401_s17 = sadd.s32 4294967294, %s534_s15   ;;  %s534_s15 = sphi %s565_s15, %s684_s15   ;;  %s530_s14 = sphi %s563_s14, %s683_s14   ;;  %s526_s13 = sphi %s561_s13, %s682_s13   ;;  %s522_s12 = sphi %s559_s12, %s681_s12  }
   0x4   : > { %s584_s18 = sadd.s32 1, %s534_s15   ;;  %s96_s19 = sadd.s32 1, %s530_s14 }
   0x5   : > { %s93_s20 = ssub.s32 %s534_s15, %s584_s18  ;;  %p106_p0 = scmp.ne.s32.totalorder %s530_s14, %s526_s13 }
   0x6   : > { %p94_p1 = scmp.eq.s32.totalorder %s93_s20, 0  ;;  %p107_p2 = scmp.eq.s32.totalorder %s580_s16, 2 }
   0x7   : > { %p112_p3 = scmp.ne.s32.totalorder %s526_s13, %s522_s12  ;;  %p113_p4 = scmp.eq.s32.totalorder %s401_s17, 2 }
   0x8   : > { %s595_s21 = scalar_select %p94_p1, %s530_s14, %s96_s19  }
   0x9   : > { %p597_p5 = por %p107_p2, %p106_p0  ;;  %p601_p6 = por %p113_p4, %p112_p3 }
   0xa   : > { %p404_p7 = scmp.ge.s32.totalorder %s534_s15, 1  ;;  %p152_p8 = scmp.lt.s32.totalorder %s534_s15, 4 }
   0xc   : > { %p153_p9 = pnand %p404_p7, %p152_p8 }
   0xd   : > { %s406_s24 = sshll.u32 (!%p153_p9), %s580_s16, 1  ;;  %s413_s7 = sshll.u32 (!%p153_p9), %s580_s16, 4 }
   0xe   : > { %156 = sbr.rel (%p153_p9) target bundleno = 840 (0x348), region = 32  ;;  %p182_p10 = scmp.lt.s32.totalorder (!%p153_p9), %s406_s24, 5 }
   0xf   : > { %s178_s8 = sand.u32 (!%p153_p9), 1, %s526_s13   ;;  %s417_s10 = sshll.u32 (!%p153_p9), %s580_s16, 7 }
  0x10   : > { %s405_s9 = sshll.u32 (!%p153_p9), %s178_s8, 3  ;;  %s640_s26 = scalar_lea.hbm (!%p153_p9), %s678_s3, %s417_s10 }
  0x11   : > { %s180_s17 = scalar_lea.vmem (!%p153_p9), [#allocation2], %s405_s9  ;;  %s317_s27 = scalar_lea.sflag (!%p153_p9), [#allocation3], %s178_s8 }
  0x12   : > { %s330_s19 = sshll.u32 (!%p153_p9), %s180_s17, 4  ;;  %s538_s16 = smov (!%p153_p9), [#allocation2]   ;;  %s331_s19 = int_to_ptr.vmem [resolvable:$true] %s330_s19 }
  0x13   : > { %v536_v0 = vmov 0   ;;  %s686_s24 = smov (!%p182_p10, %s406_s24), 5  ;;  %v198_v3 = vlaneseq  ;;  %v412_v6 = vld [vmem:[%s677_s2] ss:$0 sm:$0xff]  ;;  %v537_v7 = vmov 0.0   ;;  %vm214_vm1 = vcmask 80896  }
  0x14   : > { %465 = vset.pattern.permute.xlu0 %v536_v0  ;;  %s407_s25 = sshll.u32 %s686_s24, 3  ;;  %v275_v45 = vstv %s413_s7  ;;  %vm286_vm5 = vcmask 7168   ;;  %s478_s29 = sshll.u32 %s538_s16, 4  ;;  %s479_s29 = int_to_ptr.vmem [resolvable:$false] %s478_s29 }
  0x15   : > { %s191_s28 = scalar_lea.vmem %s676_s1, %s407_s25  ;;  %v199_v4 = vand.u32 127, %v198_v3  ;;  %s185_s6 = scalar_lea.vmem %s675_s0, %s407_s25  ;;  %v628_v44 = vshrl.u32 %v198_v3, 7 }
  0x16   : > { %v195_v1 = vld [vmem:[%s191_s28] sm:$0xff]  ;;  %v196_v2 = vld [vmem:[%s191_s28 + $0x8] sm:$0xff]  ;;  %s474_s28 = scalar_lea.vmem %s331_s19, 128  ;;  %s480_s30 = scalar_lea.vmem %s479_s29, 256 }
  0x17   : > { %201 = vperm.xlu0 %465, %v195_v1   ;;  %v193_v17 = vld [vmem:[%s185_s6] sm:$0xff]  ;;  %v194_v22 = vld [vmem:[%s185_s6 + $0x8] sm:$0xff]  ;;  %v273_v46 = vadd.s32 8, %v628_v44  ;;  %v276_v48 = vadd.s32 %v275_v45, %v628_v44  ;;  %vm311_vm6 = vcmp.lt.s32.totalorder %v628_v44, 4  ;;  %p475_p11 = scmp.ne.s32.totalorder %s331_s19, %s474_s28  ;;  %p481_p0 = scmp.lt.s32.totalorder %s331_s19, %s479_s29 }
  0x18   : > { %p482_p1 = scmp.lt.s32.totalorder %s480_s30, %s474_s28 }
  0x19   : > { %v277_v52 = vadd.s32 %v275_v45, %v273_v46  ;;  %vm278_vm3 = vcmp.lt.s32.totalorder %v276_v48, 40  ;;  %p476_p12 = pnand %p475_p11, %p597_p5 }
  0x1a   : > { %v414_v59 = vsel %vm278_vm3, 1.0, %v537_v7  ;;  %p483_p2 = por %p482_p1, %p481_p0 }
  0x1b   : > { %204 = vperm.xlu0 %465, %v196_v2   ;;  %vm279_vm4 = vcmp.lt.s32.totalorder %v277_v52, 40  ;;  %p477_p13 = pneg %p476_p12 }
  0x1c   : > { %v415_v62 = vsel %vm279_vm4, 1.0, %v537_v7 }
  0x1d   : > { %p484_p3 = pnand %p483_p2, %p477_p13 }
  0x92   : > { %v202_v5 = vpop.permute.xlu0 %201 }
  0x93   : > { %vm206_vm0 = vcmp.eq.s32.totalorder %v199_v4, %v202_v5  ;;  %v300_v5 = vsel %vm286_vm5, %v415_v62, 0.0 }
  0x94   : > { %v410_v8 = vsel %vm206_vm0, 1.0, %v537_v7 }
  0x95   : > { %v227_v9 = vmul.f32 %v412_v6, %v410_v8  ;;  %v212_v37 = vmul.f32 %v410_v8, %v193_v17 }
  0x96   : > { %v205_v10 = vpop.permute.xlu0 %204 }
  0x97   : > { %vm207_vm2 = vcmp.eq.s32.totalorder %v199_v4, %v205_v10  ;;  %v229_v11 = vsel %vm214_vm1, %v227_v9, 0.0  ;;  %v215_v38 = vsel %vm214_vm1, %v212_v37, 0.0  ;;  %v299_v4 = vsel %vm286_vm5, %v414_v59, 0.0 }
  0x98   : > { %v411_v12 = vsel %vm207_vm2, 1.0, %v537_v7  ;;  %230 = vadd.xlane.f32.xlu1 %v229_v11 }
  0x99   : > { %v228_v13 = vmul.f32 %v412_v6, %v411_v12  ;;  %v213_v39 = vmul.f32 %v411_v12, %v194_v22 }
  0x9b   : > { %v232_v14 = vsel %vm214_vm1, %v228_v13, 0.0  ;;  %v218_v40 = vsel %vm214_vm1, %v213_v39, 0.0 }
  0x9c   : > { %233 = vadd.xlane.f32.xlu1 %v232_v14 }
 0x121   : > { %v231_v15 = vpop.xlane.xlu1 %230 }
 0x122   : > { %v235_v16 = vmul.f32 %v410_v8, %v231_v15  ;;  %v301_v8 = vadd.f32 %v300_v5, %v299_v4 }
 0x124   : > { %v237_v18 = vsub.f32 %v193_v17, %v235_v16 }
 0x125   : > { %v234_v19 = vpop.xlane.xlu1 %233 }
 0x126   : > { %v236_v20 = vmul.f32 %v411_v12, %v234_v19  ;;  %v239_v21 = vmul.f32 30.0, %v237_v18 }
 0x128   : > { %v241_v23 = vsel %vm214_vm1, %v239_v21, -inf  ;;  %v238_v24 = vsub.f32 %v194_v22, %v236_v20 }
 0x129   : > { %242 = vmax.xlane.f32.xlu0 %v241_v23 }
 0x12a   : > { %v240_v25 = vmul.f32 30.0, %v238_v24 }
 0x12c   : > { %v244_v26 = vsel %vm214_vm1, %v240_v25, -inf }
 0x12d   : > { %245 = vmax.xlane.f32.xlu1 %v244_v26 }
 0x1b2   : > { %v243_v27 = vpop.xlane.xlu0 %242 }
 0x1b3   : > { %v247_v28 = vsub.f32 %v239_v21, %v243_v27 }
 0x1b5   : > { %v249_v29 = vmul.f32 1.442695, %v247_v28 }
 0x1b6   : > { %v246_v30 = vpop.xlane.xlu1 %245 }
 0x1b7   : > { %466 = vpow2.f32 %v249_v29  ;;  %v248_v31 = vsub.f32 %v240_v25, %v246_v30 }
 0x1b9   : > { %v251_v32 = vmul.f32 1.442695, %v248_v31 }
 0x1bb   : > { %468 = vpow2.f32 %v251_v32 }
 0x1c4   : > { %v467_v33 = vpop.eup %466 }
 0x1c5   : > { %v253_v34 = vsel %vm214_vm1, %v467_v33, 0.0 }
 0x1c6   : > { %254 = vadd.xlane.f32.xlu1 %v253_v34 }
 0x1c8   : > { %v469_v35 = vpop.eup %468 }
 0x1c9   : > { %v256_v36 = vsel %vm214_vm1, %v469_v35, 0.0 }
 0x1ca   : > { %257 = vadd.xlane.f32.xlu1 %v256_v36 }
 0x1ce   : > { %216 = vadd.xlane.f32.xlu1 %v215_v38 }
 0x1d2   : > { %219 = vadd.xlane.f32.xlu1 %v218_v40 }
 0x24f   : > { %v255_v41 = vpop.xlane.xlu1 %254 }
 0x250   : > { %470 = vlog2.f32 %v255_v41 }
 0x253   : > { %v258_v42 = vpop.xlane.xlu1 %257 }
 0x254   : > { %472 = vlog2.f32 %v258_v42 }
 0x257   : > { %v217_v43 = vpop.xlane.xlu1 %216 }
 0x258   : > { %v265_v47 = vsub.f32 %v217_v43, %v231_v15 }
 0x25a   : > { %v267_v54 = vmul.f32 30.0, %v265_v47 }
 0x25b   : > { %v220_v50 = vpop.xlane.xlu1 %219 }
 0x25c   : > { %v266_v55 = vsub.f32 %v220_v50, %v234_v19 }
 0x25d   : > { %v471_v49 = vpop.eup %470 }
 0x25e   : > { %v260_v51 = vmul.f32 0.6931472, %v471_v49  ;;  %v268_v61 = vmul.f32 30.0, %v266_v55 }
 0x260   : > { %v263_v53 = vadd.f32 %v260_v51, %v243_v27 }
 0x261   : > { %v473_v56 = vpop.eup %472 }
 0x262   : > { %v262_v57 = vmul.f32 0.6931472, %v473_v56  ;;  %v269_v58 = vsub.f32 %v263_v53, %v267_v54 }
 0x264   : > { %v264_v60 = vadd.f32 %v262_v57, %v246_v30  ;;  %v284_v0 = vmul.f32 %v414_v59, %v269_v58 }
 0x266   : > { %v270_v63 = vsub.f32 %v264_v60, %v268_v61  ;;  %v287_v2 = vsel %vm286_vm5, %v284_v0, 0.0 }
 0x268   : > { %v285_v1 = vmul.f32 %v415_v62, %v270_v63 }
 0x26a   : > { %v288_v3 = vsel %vm286_vm5, %v285_v1, 0.0 }
 0x26b   : > { %v289_v6 = vadd.f32 %v288_v3, %v287_v2 }
 0x26d   : > { %290 = vadd.xlane.f32.xlu1 %v289_v6 }
 0x271   : > { %302 = vadd.xlane.f32.xlu1 %v301_v8 }
 0x2f6   : > { %v291_v9 = vpop.xlane.xlu1 %290 }
 0x2f7   : > { %v292_v10 = vrot.slane %v291_v9, 4 }
 0x2f9   : > { %v293_v11 = vadd.f32 %v292_v10, %v291_v9 }
 0x2fa   : > { %v303_v12 = vpop.xlane.xlu1 %302 }
 0x2fb   : > { %v294_v13 = vrot.slane %v293_v11, 2  ;;  %v304_v7 = vrot.slane %v303_v12, 4 }
 0x2fd   : > { %v305_v14 = vadd.f32 %v304_v7, %v303_v12  ;;  %v295_v15 = vadd.f32 %v294_v13, %v293_v11 }
 0x2ff   : > { %v306_v16 = vrot.slane %v305_v14, 2  ;;  %v296_v17 = vrot.slane %v295_v15, 1 }
 0x301   : > { %v307_v18 = vadd.f32 %v306_v16, %v305_v14  ;;  %v297_v19 = vadd.f32 %v296_v17, %v295_v15 }
 0x303   : > { %420 = vpush %v297_v19  ;;  %v308_v20 = vrot.slane %v307_v18, 1 }
 0x305   : > { %v309_v21 = vadd.f32 %v308_v20, %v307_v18 }
 0x307   : > { %422 = vpush %v309_v21 }
 0x334   : > { %s421_s11 = spop %420 }
 0x335   : > { %v312_v22 = vstv %s421_s11 }
 0x338   : > { %s423_s20 = spop %422 }
 0x339   : > { %v313_v23 = vstv %s423_s20 }
 0x33a   : > { %v314_v24 = vsel %vm311_vm6, %v312_v22, %v313_v23 }
 0x33b   : > { %315 = vst [vmem:[%s180_s17] sm:$0xff] %v314_v24 }
 0x33c   : > { %487 = shalt.err (!%p484_p3)
}
 0x33d   : > { %s488_s4 = scalar_lea.hbm %s640_s26, 128  ;;  %s492_s7 = scalar_lea.hbm %s678_s3, 384 }
 0x33e   : > { %p489_p4 = scmp.ne.s32.totalorder %s640_s26, %s488_s4  ;;  %p493_p9 = scmp.lt.s32.totalorder %s640_s26, %s678_s3 }
 0x33f   : > { %p494_p10 = scmp.lt.s32.totalorder %s492_s7, %s488_s4 }
 0x340   : > { %p490_p7 = pnand %p489_p4, %p597_p5 }
 0x341   : > { %p495_p11 = por %p494_p10, %p493_p9 }
 0x342   : > { %p491_p8 = pneg %p490_p7 }
 0x344   : > { %p496_p12 = pnand %p495_p11, %p491_p8 }
 0x346   : > { %499 = shalt.err (!%p496_p12)
}
 0x347   : > { %424 = dma.vmem_to_hbm [thread:$0]  (%p597_p5), %s331_s19, 128, %s640_s26, %s317_s27  }
 0x348 PF: > { %p430_p13 = scmp.ge.s32.totalorder %s534_s15, 2  ;;  %s342_s10 = sand.u32 1, %s522_s12  }
 0x349   : > { %s343_s11 = scalar_lea.sflag [#allocation3], %s342_s10 }
 0x34a   : > { %p427_p0 = pnand %p430_p13, %p601_p6 }
 0x34c   : > { %p428_p1 = pneg %p427_p0 }
 0x34e   : > { %517 = dma.done.wait (%p428_p1), %s343_s11, 128  }
 0x34f   : > { %519 = vsyncadd (%p428_p1), %s343_s11, 4294967168  ;;  %p13_p2 = scmp.ge.s32.totalorder %s584_s18, 5   ;;  %s681_s12 = smov %s526_s13 }
 0x350   : > { %s682_s13 = smov %s530_s14  ;;  %s683_s14 = smov %s595_s21 }
 0x351   : > { %s684_s15 = smov %s584_s18  ;;  %15 = sbr.rel (!%p13_p2) target bundleno = 3 (0x3), region = 70 }
 0x356   :  { %348 = vsyncpa [#allocation3], 1 }
 0x357   :  { %350 = vsyncpa [#allocation3 + $0x1], 1 }

</bundles_post_ra>
